<compile_context>
chip_gen: v6e
topology: v6e:2x2x1
jax: 0.10.0
libtpu: 0.0.40
codegen_flags: <defaults>
</compile_context>

<pallas_src>
import functools

import jax
import jax.numpy as jnp
from jax.experimental import pallas as pl
from jax.experimental.pallas import tpu as pltpu

EPS = 1e-5  # PyTorch LayerNorm default eps


# --------------------------------------------------------------------------
# kernel: B samples per grid step, everything fused, flat [B*S, C] layout
# --------------------------------------------------------------------------
def dwconv1d_kernel(dil, T, S, B,
                    x_ref,    # (B*S, C)  bf16  zero-padded input, per-sample slabs of S rows
                    w1_ref,   # (K, C, C) bf16  w1_ref[k][i, o] = conv1_w[o, i, k]
                    b1_ref,   # (1, C)    f32
                    a_ref,    # (1,)      f32   PReLU alpha (SMEM scalar)
                    g_ref,    # (T, C)    f32   LayerNorm gamma (transposed)
                    be_ref,   # (T, C)    f32   LayerNorm beta  (transposed)
                    w2_ref,   # (C, O)    bf16  conv2 (1x1) weight, transposed
                    b2_ref,   # (1, O)    f32
                    o_ref,    # (B, T, O) f32
                    acc_ref,  # (L, C)    f32 scratch: conv1 pre-activation, L = B*S-(K-1)*dil
                    h_ref):   # (B*S, C)  f32 scratch: normalized activations (slab = S rows)
    K = w1_ref.shape[0]
    C = g_ref.shape[1]
    L = acc_ref.shape[0]

    # ---- conv1 (kernel=K, dilation=dil, 'same'): K per-tap big-M matmuls ---
    # acc[b*S + t, o] = sum_k sum_i xpad[b, t + k*dil, i] * conv1_w[o, i, k]
    # (valid for t < T because each sample's slab has >= T + (K-1)*dil rows).
    xv = x_ref[...]                                           # (B*S, C) bf16
    acc_ref[...] = jnp.dot(xv[0:L, :], w1_ref[0],
                           preferred_element_type=jnp.float32)
    for k in range(1, K):                                     # static unroll
        acc_ref[...] += jnp.dot(xv[k * dil:k * dil + L, :], w1_ref[k],
                                preferred_element_type=jnp.float32)

    # ---- per-sample PReLU + LayerNorm over (C, T), all in f32 --------------
    alpha = a_ref[0]
    inv_n = 1.0 / float(T * C)
    bias1 = b1_ref[...]
    gamma = g_ref[...]
    beta = be_ref[...]
    for b in range(B):                                        # static unroll, aligned slabs
        hb = acc_ref[b * S:b * S + T, :] + bias1              # (T, C) f32
        hb = jnp.where(hb >= 0.0, hb, alpha * hb)             # PReLU (single scalar)
        s1 = jnp.sum(hb)                                      # one-pass LN stats
        s2 = jnp.sum(hb * hb)
        m = s1 * inv_n
        var = s2 * inv_n - m * m
        hn = (hb - m) * jax.lax.rsqrt(var + EPS) * gamma + beta
        h_ref[b * S:b * S + T, :] = hn
        if S > T:  # keep pad rows deterministic (their conv2 rows are discarded)
            h_ref[b * S + T:(b + 1) * S, :] = jnp.zeros((S - T, C), jnp.float32)

    # ---- conv2: 1x1 pointwise C -> O as one lane-dense big-M matmul --------
    y = jnp.dot(h_ref[...].astype(jnp.bfloat16), w2_ref[...],
                preferred_element_type=jnp.float32)           # (B*S, O)
    bias2 = b2_ref[...]
    for b in range(B):
        o_ref[b] = (y[b * S:b * S + T, :] + bias2).astype(o_ref.dtype)


# --------------------------------------------------------------------------
# host-side parameter packing (done once)
# --------------------------------------------------------------------------
def pack_params(p):
    """Pack torch-layout params into kernel-friendly [time, chan] tensors."""
    C, _, K = p['conv1_w'].shape
    # (K, C_in, C_out) bf16: w1[k][i, o] = conv1_w[o, i, k]
    w1 = jnp.stack([p['conv1_w'][:, :, k].T for k in range(K)], axis=0)
    return dict(
        w1=w1.astype(jnp.bfloat16),
        b1=p['conv1_b'].reshape(1, C).astype(jnp.float32),
        alpha=jnp.reshape(p['prelu_a'], (1,)).astype(jnp.float32),
        g=p['ln_g'].T.astype(jnp.float32),                     # [T, C]
        beta=p['ln_b'].T.astype(jnp.float32),                  # [T, C]
        w2=p['conv2_w'][:, :, 0].T.astype(jnp.bfloat16),       # [C, O]
        b2=p['conv2_b'].reshape(1, -1).astype(jnp.float32),    # [1, O]
    )


def _round_up(x, m):
    return (x + m - 1) // m * m


def _const_spec(shape):
    """BlockSpec for a parameter kept VMEM-resident across the whole grid."""
    zeros = (0,) * len(shape)
    return pl.BlockSpec(shape, lambda n, _z=zeros: _z)


# --------------------------------------------------------------------------
# fused forward (jitted end-to-end)
# --------------------------------------------------------------------------
@functools.partial(jax.jit, static_argnames=('dilation', 'batch_block'))
def depthwise_conv1d_forward(x, packed, dilation=1, batch_block=8):
    """x: [N, in_chan, T] -> [N, out_chan, T]  (PyTorch NCT layout)."""
    N, C, T = x.shape
    K = packed['w1'].shape[0]
    O = packed['w2'].shape[1]
    d = dilation
    pad1 = (K - 1) // 2 * d                     # PyTorch 'same' padding for odd K

    B = max(1, min(batch_block, N))             # samples per grid step
    S = _round_up(T + 2 * pad1, 8)              # per-sample padded slab (8-aligned)
    if (B * S) % 16 != 0:                       # keep bf16 input block tile-aligned
        S = _round_up(S, 16)
    Npad = _round_up(N, B)
    L = B * S - (K - 1) * d

    # NCT -> NTC, time zero-pad to S, batch pad to Npad, cast to bf16.
    # (Fused into one pass by XLA under jit.)
    # TODO(synk): move this transpose/pad into the kernel to drop the HBM pass.
    xt = jnp.transpose(x, (0, 2, 1)).astype(jnp.bfloat16)
    xp = jnp.pad(xt, ((0, Npad - N), (pad1, S - T - pad1), (0, 0)))
    xflat = xp.reshape(Npad * S, C)

    out = pl.pallas_call(
        functools.partial(dwconv1d_kernel, d, T, S, B),
        out_shape=jax.ShapeDtypeStruct((Npad, T, O), jnp.float32),
        grid=(Npad // B,),
        in_specs=[
            pl.BlockSpec((B * S, C), lambda n: (n, 0)),                 # input tile
            _const_spec(packed['w1'].shape),                            # conv1 taps (bf16)
            _const_spec(packed['b1'].shape),                            # conv1 bias
            pl.BlockSpec(memory_space=pltpu.MemorySpace.SMEM),          # PReLU alpha scalar
            _const_spec(packed['g'].shape),                             # LN gamma [T,C]
            _const_spec(packed['beta'].shape),                          # LN beta  [T,C]
            _const_spec(packed['w2'].shape),                            # conv2 weight (bf16)
            _const_spec(packed['b2'].shape),                            # conv2 bias
        ],
        out_specs=pl.BlockSpec((B, T, O), lambda n: (n, 0, 0)),
        scratch_shapes=[pltpu.VMEM((L, C), jnp.float32),                # conv1 accumulator
                        pltpu.VMEM((B * S, C), jnp.float32)],           # normalized acts
        compiler_params=pltpu.CompilerParams(dimension_semantics=("parallel",)),
    )(xflat, packed['w1'], packed['b1'], packed['alpha'],
      packed['g'], packed['beta'], packed['w2'], packed['b2'])

    out = out[:N]                                # drop batch padding
    return jnp.transpose(out, (0, 2, 1))         # back to [N, out_chan, T]


# --------------------------------------------------------------------------
# pure-JAX reference (matches the PyTorch module, f32 throughout)
# --------------------------------------------------------------------------
def _ref_forward(x, p, dilation):
    K = p['conv1_w'].shape[2]
    pad1 = (K - 1) // 2 * dilation
    h = jax.lax.conv_general_dilated(
        x, p['conv1_w'], window_strides=(1,), padding=[(pad1, pad1)],
        rhs_dilation=(dilation,), dimension_numbers=('NCH', 'OIH', 'NCH'),
        precision=jax.lax.Precision.HIGHEST)
    h = h + p['conv1_b'][None, :, None]
    h = jnp.where(h >= 0, h, p['prelu_a'] * h)                       # scalar PReLU
    m = jnp.mean(h, axis=(1, 2), keepdims=True)                      # LN over (C, T)
    v = jnp.mean((h - m) ** 2, axis=(1, 2), keepdims=True)
    h = (h - m) / jnp.sqrt(v + EPS) * p['ln_g'][None] + p['ln_b'][None]
    y = jnp.einsum('oc,nct->not', p['conv2_w'][:, :, 0], h,
                   precision=jax.lax.Precision.HIGHEST)
    return y + p['conv2_b'][None, :, None]


# --------------------------------------------------------------------------
if __name__ == "__main__":
    # Small shapes consistent with the module (defaults in_chan=512, T=50,
    # out_chan=1024, kernel=3), scaled down but lane-aligned (C, O mult. of 128).
    N, C, T, O, K = 6, 128, 16, 256, 3

    key = jax.random.PRNGKey(0)
    ks = jax.random.split(key, 7)
    params = dict(
        conv1_w=0.1 * jax.random.normal(ks[0], (C, C, K), jnp.float32),
        conv1_b=0.1 * jax.random.normal(ks[1], (C,), jnp.float32),
        prelu_a=jnp.float32(0.25),
        ln_g=1.0 + 0.1 * jax.random.normal(ks[2], (C, T), jnp.float32),
        ln_b=0.1 * jax.random.normal(ks[3], (C, T), jnp.float32),
        conv2_w=0.1 * jax.random.normal(ks[4], (O, C, 1), jnp.float32),
        conv2_b=0.1 * jax.random.normal(ks[5], (O,), jnp.float32),
    )
    x = jax.random.normal(ks[6], (N, C, T), jnp.float32)
    packed = pack_params(params)

    # Exercise multi-step grid + batch padding (N=6, B=4 -> Npad=8, grid=2)
    # and two dilations.
    for dil in (1, 2):
        out = depthwise_conv1d_forward(x, packed, dilation=dil, batch_block=4)
        out = jax.block_until_ready(out)
        ref = _ref_forward(x, params, dil)
        assert out.shape == (N, O, T), out.shape
        max_err = float(jnp.max(jnp.abs(out - ref)))
        # bf16 MXU operands with f32 accumulation -> loosen tolerance slightly.
        if not jnp.allclose(out, ref, rtol=5e-2, atol=5e-2):
            raise AssertionError(
                f"dilation={dil}: mismatch vs reference, max abs diff {max_err}")
    print("KERNEL_OK")
</pallas_src>

<mosaic_0001>
module attributes {stable_mosaic.version = 11 : i64} {
  func.func @dwconv1d_kernel(%arg0: i32, %arg1: memref<96x128xbf16, #tpu.memory_space<vmem>>, %arg2: memref<3x128x128xbf16, #tpu.memory_space<vmem>>, %arg3: memref<1x128xf32, #tpu.memory_space<vmem>>, %arg4: memref<1xf32, #tpu.memory_space<smem>>, %arg5: memref<16x128xf32, #tpu.memory_space<vmem>>, %arg6: memref<16x128xf32, #tpu.memory_space<vmem>>, %arg7: memref<128x256xbf16, #tpu.memory_space<vmem>>, %arg8: memref<1x256xf32, #tpu.memory_space<vmem>>, %arg9: memref<4x16x256xf32, #tpu.memory_space<vmem>>, %arg10: memref<94x128xf32, #tpu.memory_space<vmem>>, %arg11: memref<96x128xf32, #tpu.memory_space<vmem>>) attributes {dimension_semantics = [#tpu.dimension_semantics<parallel>], iteration_bounds = array<i64: 2>, scalar_prefetch = 0 : i64, scratch_operands = 2 : i64, tpu.core_type = #tpu.core_type<tc>, window_params = [{transform_indices = @transform_0, window_bounds = array<i64: 96, 128>}, {pipeline_mode = #tpu.pipeline_mode<synchronous>, transform_indices = @transform_1, window_bounds = array<i64: 3, 128, 128>}, {pipeline_mode = #tpu.pipeline_mode<synchronous>, transform_indices = @transform_2, window_bounds = array<i64: 1, 128>}, {transform_indices = @transform_3, window_bounds = array<i64: 1>}, {pipeline_mode = #tpu.pipeline_mode<synchronous>, transform_indices = @transform_4, window_bounds = array<i64: 16, 128>}, {pipeline_mode = #tpu.pipeline_mode<synchronous>, transform_indices = @transform_5, window_bounds = array<i64: 16, 128>}, {pipeline_mode = #tpu.pipeline_mode<synchronous>, transform_indices = @transform_6, window_bounds = array<i64: 128, 256>}, {pipeline_mode = #tpu.pipeline_mode<synchronous>, transform_indices = @transform_7, window_bounds = array<i64: 1, 256>}, {transform_indices = @transform_8, window_bounds = array<i64: 4, 16, 256>}]} {
    %c0 = arith.constant 0 : index
    %c0_0 = arith.constant 0 : index
    %0 = vector.load %arg1[%c0, %c0_0] : memref<96x128xbf16, #tpu.memory_space<vmem>>, vector<96x128xbf16>
    %1 = vector.extract_strided_slice %0 {offsets = [0, 0], sizes = [94, 128], strides = [1, 1]} : vector<96x128xbf16> to vector<94x128xbf16>
    %c0_1 = arith.constant 0 : index
    %c0_2 = arith.constant 0 : index
    %c0_3 = arith.constant 0 : index
    %2 = vector.load %arg2[%c0_1, %c0_2, %c0_3] : memref<3x128x128xbf16, #tpu.memory_space<vmem>>, vector<1x128x128xbf16>
    %3 = vector.shape_cast %2 : vector<1x128x128xbf16> to vector<128x128xbf16>
    %cst = arith.constant dense<0.000000e+00> : vector<94x128xf32>
    %4 = tpu.matmul %1, %3, %cst {dimension_numbers = #tpu.dot_dimension_numbers<[1], [0], [0], [1], [0, 0, 1, 1], [], []>} : vector<94x128xbf16>, vector<128x128xbf16>, vector<94x128xf32> -> vector<94x128xf32>
    %c0_4 = arith.constant 0 : index
    %c0_5 = arith.constant 0 : index
    %5 = vector.load %arg10[%c0_4, %c0_5] : memref<94x128xf32, #tpu.memory_space<vmem>>, vector<94x128xf32>
    tpu.vector_store %arg10[%c0_4, %c0_5], %4 {strides = array<i32>} : memref<94x128xf32, #tpu.memory_space<vmem>>, vector<94x128xf32>,
    %c0_6 = arith.constant 0 : index
    %c0_7 = arith.constant 0 : index
    %6 = vector.load %arg10[%c0_6, %c0_7] : memref<94x128xf32, #tpu.memory_space<vmem>>, vector<94x128xf32>
    %7 = vector.extract_strided_slice %0 {offsets = [1, 0], sizes = [94, 128], strides = [1, 1]} : vector<96x128xbf16> to vector<94x128xbf16>
    %c1 = arith.constant 1 : index
    %c0_8 = arith.constant 0 : index
    %c0_9 = arith.constant 0 : index
    %8 = vector.load %arg2[%c1, %c0_8, %c0_9] : memref<3x128x128xbf16, #tpu.memory_space<vmem>>, vector<1x128x128xbf16>
    %9 = vector.shape_cast %8 : vector<1x128x128xbf16> to vector<128x128xbf16>
    %cst_10 = arith.constant dense<0.000000e+00> : vector<94x128xf32>
    %10 = tpu.matmul %7, %9, %cst_10 {dimension_numbers = #tpu.dot_dimension_numbers<[1], [0], [0], [1], [0, 0, 1, 1], [], []>} : vector<94x128xbf16>, vector<128x128xbf16>, vector<94x128xf32> -> vector<94x128xf32>
    %11 = arith.addf %6, %10 : vector<94x128xf32>
    %c0_11 = arith.constant 0 : index
    %c0_12 = arith.constant 0 : index
    %12 = vector.load %arg10[%c0_11, %c0_12] : memref<94x128xf32, #tpu.memory_space<vmem>>, vector<94x128xf32>
    tpu.vector_store %arg10[%c0_11, %c0_12], %11 {strides = array<i32>} : memref<94x128xf32, #tpu.memory_space<vmem>>, vector<94x128xf32>,
    %c0_13 = arith.constant 0 : index
    %c0_14 = arith.constant 0 : index
    %13 = vector.load %arg10[%c0_13, %c0_14] : memref<94x128xf32, #tpu.memory_space<vmem>>, vector<94x128xf32>
    %14 = vector.extract_strided_slice %0 {offsets = [2, 0], sizes = [94, 128], strides = [1, 1]} : vector<96x128xbf16> to vector<94x128xbf16>
    %c2 = arith.constant 2 : index
    %c0_15 = arith.constant 0 : index
    %c0_16 = arith.constant 0 : index
    %15 = vector.load %arg2[%c2, %c0_15, %c0_16] : memref<3x128x128xbf16, #tpu.memory_space<vmem>>, vector<1x128x128xbf16>
    %16 = vector.shape_cast %15 : vector<1x128x128xbf16> to vector<128x128xbf16>
    %cst_17 = arith.constant dense<0.000000e+00> : vector<94x128xf32>
    %17 = tpu.matmul %14, %16, %cst_17 {dimension_numbers = #tpu.dot_dimension_numbers<[1], [0], [0], [1], [0, 0, 1, 1], [], []>} : vector<94x128xbf16>, vector<128x128xbf16>, vector<94x128xf32> -> vector<94x128xf32>
    %18 = arith.addf %13, %17 : vector<94x128xf32>
    %c0_18 = arith.constant 0 : index
    %c0_19 = arith.constant 0 : index
    %19 = vector.load %arg10[%c0_18, %c0_19] : memref<94x128xf32, #tpu.memory_space<vmem>>, vector<94x128xf32>
    tpu.vector_store %arg10[%c0_18, %c0_19], %18 {strides = array<i32>} : memref<94x128xf32, #tpu.memory_space<vmem>>, vector<94x128xf32>,
    %c0_20 = arith.constant 0 : index
    %20 = memref.load %arg4[%c0_20] : memref<1xf32, #tpu.memory_space<smem>>
    %c0_21 = arith.constant 0 : index
    %c0_22 = arith.constant 0 : index
    %21 = vector.load %arg3[%c0_21, %c0_22] : memref<1x128xf32, #tpu.memory_space<vmem>>, vector<1x128xf32>
    %c0_23 = arith.constant 0 : index
    %c0_24 = arith.constant 0 : index
    %22 = vector.load %arg5[%c0_23, %c0_24] : memref<16x128xf32, #tpu.memory_space<vmem>>, vector<16x128xf32>
    %c0_25 = arith.constant 0 : index
    %c0_26 = arith.constant 0 : index
    %23 = vector.load %arg6[%c0_25, %c0_26] : memref<16x128xf32, #tpu.memory_space<vmem>>, vector<16x128xf32>
    %c0_27 = arith.constant 0 : index
    %c0_28 = arith.constant 0 : index
    %24 = vector.load %arg10[%c0_27, %c0_28] : memref<94x128xf32, #tpu.memory_space<vmem>>, vector<16x128xf32>
    %25 = vector.broadcast %21 : vector<1x128xf32> to vector<16x128xf32>
    %26 = arith.addf %24, %25 : vector<16x128xf32>
    %cst_29 = arith.constant 0.000000e+00 : f32
    %27 = vector.broadcast %cst_29 : f32 to vector<16x128xf32>
    %28 = arith.cmpf oge, %26, %27 : vector<16x128xf32>
    %29 = vector.broadcast %20 : f32 to vector<16x128xf32>
    %30 = arith.mulf %29, %26 : vector<16x128xf32>
    %31 = arith.select %28, %26, %30 : vector<16x128xi1>, vector<16x128xf32>
    %32 = vector.shape_cast %31 : vector<16x128xf32> to vector<1x16x128xf32>
    %cst_30 = arith.constant dense<0.000000e+00> : vector<1xf32>
    %33 = vector.multi_reduction <add>, %32, %cst_30 [1, 2] : vector<1x16x128xf32> to vector<1xf32>
    %34 = vector.shape_cast %33 : vector<1xf32> to vector<1x1x1xf32>
    %35 = vector.extract %34[0, 0, 0] : f32 from vector<1x1x1xf32>
    %36 = arith.mulf %31, %31 : vector<16x128xf32>
    %37 = vector.shape_cast %36 : vector<16x128xf32> to vector<1x16x128xf32>
    %cst_31 = arith.constant dense<0.000000e+00> : vector<1xf32>
    %38 = vector.multi_reduction <add>, %37, %cst_31 [1, 2] : vector<1x16x128xf32> to vector<1xf32>
    %39 = vector.shape_cast %38 : vector<1xf32> to vector<1x1x1xf32>
    %40 = vector.extract %39[0, 0, 0] : f32 from vector<1x1x1xf32>
    %cst_32 = arith.constant 4.8828125E-4 : f32
    %41 = arith.mulf %35, %cst_32 : f32
    %cst_33 = arith.constant 4.8828125E-4 : f32
    %42 = arith.mulf %40, %cst_33 : f32
    %43 = arith.mulf %41, %41 : f32
    %44 = arith.subf %42, %43 : f32
    %45 = vector.broadcast %41 : f32 to vector<16x128xf32>
    %46 = arith.subf %31, %45 : vector<16x128xf32>
    %cst_34 = arith.constant 9.99999974E-6 : f32
    %47 = arith.addf %44, %cst_34 : f32
    %48 = math.rsqrt %47 : f32
    %49 = vector.broadcast %48 : f32 to vector<16x128xf32>
    %50 = arith.mulf %46, %49 : vector<16x128xf32>
    %51 = arith.mulf %50, %22 : vector<16x128xf32>
    %52 = arith.addf %51, %23 : vector<16x128xf32>
    %c0_35 = arith.constant 0 : index
    %c0_36 = arith.constant 0 : index
    %53 = vector.load %arg11[%c0_35, %c0_36] : memref<96x128xf32, #tpu.memory_space<vmem>>, vector<16x128xf32>
    tpu.vector_store %arg11[%c0_35, %c0_36], %52 {strides = array<i32>} : memref<96x128xf32, #tpu.memory_space<vmem>>, vector<16x128xf32>,
    %cst_37 = arith.constant 0.000000e+00 : f32
    %54 = vector.broadcast %cst_37 : f32 to vector<8x128xf32>
    %c16 = arith.constant 16 : index
    %c0_38 = arith.constant 0 : index
    %55 = vector.load %arg11[%c16, %c0_38] : memref<96x128xf32, #tpu.memory_space<vmem>>, vector<8x128xf32>
    tpu.vector_store %arg11[%c16, %c0_38], %54 {strides = array<i32>} : memref<96x128xf32, #tpu.memory_space<vmem>>, vector<8x128xf32>,
    %c24 = arith.constant 24 : index
    %c0_39 = arith.constant 0 : index
    %56 = vector.load %arg10[%c24, %c0_39] : memref<94x128xf32, #tpu.memory_space<vmem>>, vector<16x128xf32>
    %57 = vector.broadcast %21 : vector<1x128xf32> to vector<16x128xf32>
    %58 = arith.addf %56, %57 : vector<16x128xf32>
    %cst_40 = arith.constant 0.000000e+00 : f32
    %59 = vector.broadcast %cst_40 : f32 to vector<16x128xf32>
    %60 = arith.cmpf oge, %58, %59 : vector<16x128xf32>
    %61 = vector.broadcast %20 : f32 to vector<16x128xf32>
    %62 = arith.mulf %61, %58 : vector<16x128xf32>
    %63 = arith.select %60, %58, %62 : vector<16x128xi1>, vector<16x128xf32>
    %64 = vector.shape_cast %63 : vector<16x128xf32> to vector<1x16x128xf32>
    %cst_41 = arith.constant dense<0.000000e+00> : vector<1xf32>
    %65 = vector.multi_reduction <add>, %64, %cst_41 [1, 2] : vector<1x16x128xf32> to vector<1xf32>
    %66 = vector.shape_cast %65 : vector<1xf32> to vector<1x1x1xf32>
    %67 = vector.extract %66[0, 0, 0] : f32 from vector<1x1x1xf32>
    %68 = arith.mulf %63, %63 : vector<16x128xf32>
    %69 = vector.shape_cast %68 : vector<16x128xf32> to vector<1x16x128xf32>
    %cst_42 = arith.constant dense<0.000000e+00> : vector<1xf32>
    %70 = vector.multi_reduction <add>, %69, %cst_42 [1, 2] : vector<1x16x128xf32> to vector<1xf32>
    %71 = vector.shape_cast %70 : vector<1xf32> to vector<1x1x1xf32>
    %72 = vector.extract %71[0, 0, 0] : f32 from vector<1x1x1xf32>
    %cst_43 = arith.constant 4.8828125E-4 : f32
    %73 = arith.mulf %67, %cst_43 : f32
    %cst_44 = arith.constant 4.8828125E-4 : f32
    %74 = arith.mulf %72, %cst_44 : f32
    %75 = arith.mulf %73, %73 : f32
    %76 = arith.subf %74, %75 : f32
    %77 = vector.broadcast %73 : f32 to vector<16x128xf32>
    %78 = arith.subf %63, %77 : vector<16x128xf32>
    %cst_45 = arith.constant 9.99999974E-6 : f32
    %79 = arith.addf %76, %cst_45 : f32
    %80 = math.rsqrt %79 : f32
    %81 = vector.broadcast %80 : f32 to vector<16x128xf32>
    %82 = arith.mulf %78, %81 : vector<16x128xf32>
    %83 = arith.mulf %82, %22 : vector<16x128xf32>
    %84 = arith.addf %83, %23 : vector<16x128xf32>
    %c24_46 = arith.constant 24 : index
    %c0_47 = arith.constant 0 : index
    %85 = vector.load %arg11[%c24_46, %c0_47] : memref<96x128xf32, #tpu.memory_space<vmem>>, vector<16x128xf32>
    tpu.vector_store %arg11[%c24_46, %c0_47], %84 {strides = array<i32>} : memref<96x128xf32, #tpu.memory_space<vmem>>, vector<16x128xf32>,
    %cst_48 = arith.constant 0.000000e+00 : f32
    %86 = vector.broadcast %cst_48 : f32 to vector<8x128xf32>
    %c40 = arith.constant 40 : index
    %c0_49 = arith.constant 0 : index
    %87 = vector.load %arg11[%c40, %c0_49] : memref<96x128xf32, #tpu.memory_space<vmem>>, vector<8x128xf32>
    tpu.vector_store %arg11[%c40, %c0_49], %86 {strides = array<i32>} : memref<96x128xf32, #tpu.memory_space<vmem>>, vector<8x128xf32>,
    %c48 = arith.constant 48 : index
    %c0_50 = arith.constant 0 : index
    %88 = vector.load %arg10[%c48, %c0_50] : memref<94x128xf32, #tpu.memory_space<vmem>>, vector<16x128xf32>
    %89 = vector.broadcast %21 : vector<1x128xf32> to vector<16x128xf32>
    %90 = arith.addf %88, %89 : vector<16x128xf32>
    %cst_51 = arith.constant 0.000000e+00 : f32
    %91 = vector.broadcast %cst_51 : f32 to vector<16x128xf32>
    %92 = arith.cmpf oge, %90, %91 : vector<16x128xf32>
    %93 = vector.broadcast %20 : f32 to vector<16x128xf32>
    %94 = arith.mulf %93, %90 : vector<16x128xf32>
    %95 = arith.select %92, %90, %94 : vector<16x128xi1>, vector<16x128xf32>
    %96 = vector.shape_cast %95 : vector<16x128xf32> to vector<1x16x128xf32>
    %cst_52 = arith.constant dense<0.000000e+00> : vector<1xf32>
    %97 = vector.multi_reduction <add>, %96, %cst_52 [1, 2] : vector<1x16x128xf32> to vector<1xf32>
    %98 = vector.shape_cast %97 : vector<1xf32> to vector<1x1x1xf32>
    %99 = vector.extract %98[0, 0, 0] : f32 from vector<1x1x1xf32>
    %100 = arith.mulf %95, %95 : vector<16x128xf32>
    %101 = vector.shape_cast %100 : vector<16x128xf32> to vector<1x16x128xf32>
    %cst_53 = arith.constant dense<0.000000e+00> : vector<1xf32>
    %102 = vector.multi_reduction <add>, %101, %cst_53 [1, 2] : vector<1x16x128xf32> to vector<1xf32>
    %103 = vector.shape_cast %102 : vector<1xf32> to vector<1x1x1xf32>
    %104 = vector.extract %103[0, 0, 0] : f32 from vector<1x1x1xf32>
    %cst_54 = arith.constant 4.8828125E-4 : f32
    %105 = arith.mulf %99, %cst_54 : f32
    %cst_55 = arith.constant 4.8828125E-4 : f32
    %106 = arith.mulf %104, %cst_55 : f32
    %107 = arith.mulf %105, %105 : f32
    %108 = arith.subf %106, %107 : f32
    %109 = vector.broadcast %105 : f32 to vector<16x128xf32>
    %110 = arith.subf %95, %109 : vector<16x128xf32>
    %cst_56 = arith.constant 9.99999974E-6 : f32
    %111 = arith.addf %108, %cst_56 : f32
    %112 = math.rsqrt %111 : f32
    %113 = vector.broadcast %112 : f32 to vector<16x128xf32>
    %114 = arith.mulf %110, %113 : vector<16x128xf32>
    %115 = arith.mulf %114, %22 : vector<16x128xf32>
    %116 = arith.addf %115, %23 : vector<16x128xf32>
    %c48_57 = arith.constant 48 : index
    %c0_58 = arith.constant 0 : index
    %117 = vector.load %arg11[%c48_57, %c0_58] : memref<96x128xf32, #tpu.memory_space<vmem>>, vector<16x128xf32>
    tpu.vector_store %arg11[%c48_57, %c0_58], %116 {strides = array<i32>} : memref<96x128xf32, #tpu.memory_space<vmem>>, vector<16x128xf32>,
    %cst_59 = arith.constant 0.000000e+00 : f32
    %118 = vector.broadcast %cst_59 : f32 to vector<8x128xf32>
    %c64 = arith.constant 64 : index
    %c0_60 = arith.constant 0 : index
    %119 = vector.load %arg11[%c64, %c0_60] : memref<96x128xf32, #tpu.memory_space<vmem>>, vector<8x128xf32>
    tpu.vector_store %arg11[%c64, %c0_60], %118 {strides = array<i32>} : memref<96x128xf32, #tpu.memory_space<vmem>>, vector<8x128xf32>,
    %c72 = arith.constant 72 : index
    %c0_61 = arith.constant 0 : index
    %120 = vector.load %arg10[%c72, %c0_61] : memref<94x128xf32, #tpu.memory_space<vmem>>, vector<16x128xf32>
    %121 = vector.broadcast %21 : vector<1x128xf32> to vector<16x128xf32>
    %122 = arith.addf %120, %121 : vector<16x128xf32>
    %cst_62 = arith.constant 0.000000e+00 : f32
    %123 = vector.broadcast %cst_62 : f32 to vector<16x128xf32>
    %124 = arith.cmpf oge, %122, %123 : vector<16x128xf32>
    %125 = vector.broadcast %20 : f32 to vector<16x128xf32>
    %126 = arith.mulf %125, %122 : vector<16x128xf32>
    %127 = arith.select %124, %122, %126 : vector<16x128xi1>, vector<16x128xf32>
    %128 = vector.shape_cast %127 : vector<16x128xf32> to vector<1x16x128xf32>
    %cst_63 = arith.constant dense<0.000000e+00> : vector<1xf32>
    %129 = vector.multi_reduction <add>, %128, %cst_63 [1, 2] : vector<1x16x128xf32> to vector<1xf32>
    %130 = vector.shape_cast %129 : vector<1xf32> to vector<1x1x1xf32>
    %131 = vector.extract %130[0, 0, 0] : f32 from vector<1x1x1xf32>
    %132 = arith.mulf %127, %127 : vector<16x128xf32>
    %133 = vector.shape_cast %132 : vector<16x128xf32> to vector<1x16x128xf32>
    %cst_64 = arith.constant dense<0.000000e+00> : vector<1xf32>
    %134 = vector.multi_reduction <add>, %133, %cst_64 [1, 2] : vector<1x16x128xf32> to vector<1xf32>
    %135 = vector.shape_cast %134 : vector<1xf32> to vector<1x1x1xf32>
    %136 = vector.extract %135[0, 0, 0] : f32 from vector<1x1x1xf32>
    %cst_65 = arith.constant 4.8828125E-4 : f32
    %137 = arith.mulf %131, %cst_65 : f32
    %cst_66 = arith.constant 4.8828125E-4 : f32
    %138 = arith.mulf %136, %cst_66 : f32
    %139 = arith.mulf %137, %137 : f32
    %140 = arith.subf %138, %139 : f32
    %141 = vector.broadcast %137 : f32 to vector<16x128xf32>
    %142 = arith.subf %127, %141 : vector<16x128xf32>
    %cst_67 = arith.constant 9.99999974E-6 : f32
    %143 = arith.addf %140, %cst_67 : f32
    %144 = math.rsqrt %143 : f32
    %145 = vector.broadcast %144 : f32 to vector<16x128xf32>
    %146 = arith.mulf %142, %145 : vector<16x128xf32>
    %147 = arith.mulf %146, %22 : vector<16x128xf32>
    %148 = arith.addf %147, %23 : vector<16x128xf32>
    %c72_68 = arith.constant 72 : index
    %c0_69 = arith.constant 0 : index
    %149 = vector.load %arg11[%c72_68, %c0_69] : memref<96x128xf32, #tpu.memory_space<vmem>>, vector<16x128xf32>
    tpu.vector_store %arg11[%c72_68, %c0_69], %148 {strides = array<i32>} : memref<96x128xf32, #tpu.memory_space<vmem>>, vector<16x128xf32>,
    %cst_70 = arith.constant 0.000000e+00 : f32
    %150 = vector.broadcast %cst_70 : f32 to vector<8x128xf32>
    %c88 = arith.constant 88 : index
    %c0_71 = arith.constant 0 : index
    %151 = vector.load %arg11[%c88, %c0_71] : memref<96x128xf32, #tpu.memory_space<vmem>>, vector<8x128xf32>
    tpu.vector_store %arg11[%c88, %c0_71], %150 {strides = array<i32>} : memref<96x128xf32, #tpu.memory_space<vmem>>, vector<8x128xf32>,
    %c0_72 = arith.constant 0 : index
    %c0_73 = arith.constant 0 : index
    %152 = vector.load %arg11[%c0_72, %c0_73] : memref<96x128xf32, #tpu.memory_space<vmem>>, vector<96x128xf32>
    %153 = arith.truncf %152 : vector<96x128xf32> to vector<96x128xbf16>
    %c0_74 = arith.constant 0 : index
    %c0_75 = arith.constant 0 : index
    %154 = vector.load %arg7[%c0_74, %c0_75] : memref<128x256xbf16, #tpu.memory_space<vmem>>, vector<128x256xbf16>
    %cst_76 = arith.constant dense<0.000000e+00> : vector<96x256xf32>
    %155 = tpu.matmul %153, %154, %cst_76 {dimension_numbers = #tpu.dot_dimension_numbers<[1], [0], [0], [1], [0, 0, 1, 1], [], []>} : vector<96x128xbf16>, vector<128x256xbf16>, vector<96x256xf32> -> vector<96x256xf32>
    %c0_77 = arith.constant 0 : index
    %c0_78 = arith.constant 0 : index
    %156 = vector.load %arg8[%c0_77, %c0_78] : memref<1x256xf32, #tpu.memory_space<vmem>>, vector<1x256xf32>
    %157 = vector.extract_strided_slice %155 {offsets = [0, 0], sizes = [16, 256], strides = [1, 1]} : vector<96x256xf32> to vector<16x256xf32>
    %158 = vector.broadcast %156 : vector<1x256xf32> to vector<16x256xf32>
    %159 = arith.addf %157, %158 : vector<16x256xf32>
    %c0_79 = arith.constant 0 : index
    %c0_80 = arith.constant 0 : index
    %c0_81 = arith.constant 0 : index
    %160 = vector.load %arg9[%c0_79, %c0_80, %c0_81] : memref<4x16x256xf32, #tpu.memory_space<vmem>>, vector<1x16x256xf32>
    %161 = vector.shape_cast %160 : vector<1x16x256xf32> to vector<16x256xf32>
    %162 = vector.shape_cast %159 : vector<16x256xf32> to vector<1x16x256xf32>
    tpu.vector_store %arg9[%c0_79, %c0_80, %c0_81], %162 {strides = array<i32>} : memref<4x16x256xf32, #tpu.memory_space<vmem>>, vector<1x16x256xf32>,
    %163 = vector.extract_strided_slice %155 {offsets = [24, 0], sizes = [16, 256], strides = [1, 1]} : vector<96x256xf32> to vector<16x256xf32>
    %164 = vector.broadcast %156 : vector<1x256xf32> to vector<16x256xf32>
    %165 = arith.addf %163, %164 : vector<16x256xf32>
    %c1_82 = arith.constant 1 : index
    %c0_83 = arith.constant 0 : index
    %c0_84 = arith.constant 0 : index
    %166 = vector.load %arg9[%c1_82, %c0_83, %c0_84] : memref<4x16x256xf32, #tpu.memory_space<vmem>>, vector<1x16x256xf32>
    %167 = vector.shape_cast %166 : vector<1x16x256xf32> to vector<16x256xf32>
    %168 = vector.shape_cast %165 : vector<16x256xf32> to vector<1x16x256xf32>
    tpu.vector_store %arg9[%c1_82, %c0_83, %c0_84], %168 {strides = array<i32>} : memref<4x16x256xf32, #tpu.memory_space<vmem>>, vector<1x16x256xf32>,
    %169 = vector.extract_strided_slice %155 {offsets = [48, 0], sizes = [16, 256], strides = [1, 1]} : vector<96x256xf32> to vector<16x256xf32>
    %170 = vector.broadcast %156 : vector<1x256xf32> to vector<16x256xf32>
    %171 = arith.addf %169, %170 : vector<16x256xf32>
    %c2_85 = arith.constant 2 : index
    %c0_86 = arith.constant 0 : index
    %c0_87 = arith.constant 0 : index
    %172 = vector.load %arg9[%c2_85, %c0_86, %c0_87] : memref<4x16x256xf32, #tpu.memory_space<vmem>>, vector<1x16x256xf32>
    %173 = vector.shape_cast %172 : vector<1x16x256xf32> to vector<16x256xf32>
    %174 = vector.shape_cast %171 : vector<16x256xf32> to vector<1x16x256xf32>
    tpu.vector_store %arg9[%c2_85, %c0_86, %c0_87], %174 {strides = array<i32>} : memref<4x16x256xf32, #tpu.memory_space<vmem>>, vector<1x16x256xf32>,
    %175 = vector.extract_strided_slice %155 {offsets = [72, 0], sizes = [16, 256], strides = [1, 1]} : vector<96x256xf32> to vector<16x256xf32>
    %176 = vector.broadcast %156 : vector<1x256xf32> to vector<16x256xf32>
    %177 = arith.addf %175, %176 : vector<16x256xf32>
    %c3 = arith.constant 3 : index
    %c0_88 = arith.constant 0 : index
    %c0_89 = arith.constant 0 : index
    %178 = vector.load %arg9[%c3, %c0_88, %c0_89] : memref<4x16x256xf32, #tpu.memory_space<vmem>>, vector<1x16x256xf32>
    %179 = vector.shape_cast %178 : vector<1x16x256xf32> to vector<16x256xf32>
    %180 = vector.shape_cast %177 : vector<16x256xf32> to vector<1x16x256xf32>
    tpu.vector_store %arg9[%c3, %c0_88, %c0_89], %180 {strides = array<i32>} : memref<4x16x256xf32, #tpu.memory_space<vmem>>, vector<1x16x256xf32>,
    return
  }
  func.func @transform_0(%arg0: i32) -> (i32, i32) {
    %c0_i32 = arith.constant 0 : i32
    %c0_i32_0 = arith.constant 0 : i32
    return %arg0, %c0_i32 : i32, i32
  }
  func.func @transform_1(%arg0: i32) -> (i32, i32, i32) {
    %c0_i32 = arith.constant 0 : i32
    %c0_i32_0 = arith.constant 0 : i32
    %c0_i32_1 = arith.constant 0 : i32
    %c0_i32_2 = arith.constant 0 : i32
    return %c0_i32, %c0_i32_0, %c0_i32_1 : i32, i32, i32
  }
  func.func @transform_2(%arg0: i32) -> (i32, i32) {
    %c0_i32 = arith.constant 0 : i32
    %c0_i32_0 = arith.constant 0 : i32
    %c0_i32_1 = arith.constant 0 : i32
    return %c0_i32, %c0_i32_0 : i32, i32
  }
  func.func @transform_3(%arg0: i32) -> i32 {
    %c0_i32 = arith.constant 0 : i32
    %c0_i32_0 = arith.constant 0 : i32
    return %c0_i32 : i32
  }
  func.func @transform_4(%arg0: i32) -> (i32, i32) {
    %c0_i32 = arith.constant 0 : i32
    %c0_i32_0 = arith.constant 0 : i32
    %c0_i32_1 = arith.constant 0 : i32
    return %c0_i32, %c0_i32_0 : i32, i32
  }
  func.func @transform_5(%arg0: i32) -> (i32, i32) {
    %c0_i32 = arith.constant 0 : i32
    %c0_i32_0 = arith.constant 0 : i32
    %c0_i32_1 = arith.constant 0 : i32
    return %c0_i32, %c0_i32_0 : i32, i32
  }
  func.func @transform_6(%arg0: i32) -> (i32, i32) {
    %c0_i32 = arith.constant 0 : i32
    %c0_i32_0 = arith.constant 0 : i32
    %c0_i32_1 = arith.constant 0 : i32
    return %c0_i32, %c0_i32_0 : i32, i32
  }
  func.func @transform_7(%arg0: i32) -> (i32, i32) {
    %c0_i32 = arith.constant 0 : i32
    %c0_i32_0 = arith.constant 0 : i32
    %c0_i32_1 = arith.constant 0 : i32
    return %c0_i32, %c0_i32_0 : i32, i32
  }
  func.func @transform_8(%arg0: i32) -> (i32, i32, i32) {
    %c0_i32 = arith.constant 0 : i32
    %c0_i32_0 = arith.constant 0 : i32
    %c0_i32_1 = arith.constant 0 : i32
    return %arg0, %c0_i32, %c0_i32_0 : i32, i32, i32
  }
}

</mosaic_0001>

<bundles_post_ra>
// kernel: depthwise_conv1d_forward.1
= control target key start
LH: loop header
LB: loop body
LE: loop exit
PB: predicated region body
PF: predicated region fallthrough
CT: control target
= control target key end

     0   :  { %s2298_s0 = inlined_call_operand.vmem [shape: bf16[192,128], index: 0, kind: input, shape index: {}]   ;;  %s2299_s1 = inlined_call_operand.vmem [shape: bf16[3,128,128], index: 1, kind: input, shape index: {}]   ;;  %s2300_s2 = inlined_call_operand.vmem [shape: f32[1,128], index: 2, kind: input, shape index: {}]   ;;  %s2301_s3 = inlined_call_operand.<no memory space> [shape: f32[1], index: 3, kind: input, shape index: {}]   ;;  %s2302_s4 = inlined_call_operand.vmem [shape: f32[16,128], index: 4, kind: input, shape index: {}]   ;;  %s2303_s5 = inlined_call_operand.vmem [shape: f32[16,128], index: 5, kind: input, shape index: {}]   ;;  %s2304_s6 = inlined_call_operand.hbm [shape: bf16[128,256], index: 6, kind: input, shape index: {}]   ;;  %s2305_s7 = inlined_call_operand.vmem [shape: f32[1,256], index: 7, kind: input, shape index: {}]   ;;  %s2306_s8 = inlined_call_operand.vmem [shape: f32[8,16,256], index: 8, kind: output, shape index: {}]  }
   0x1   :  { %13 = sst [smem:[#allocation4]] %s2301_s3 }
   0x2   :  { %14 = vsyncpa [#allocation6], 0  ;;  %s1957_s29 = smov 0  }
   0x3 LB: > { %s1963_s30 = sadd.s32 4294967295, %s1902_s29   ;;  %p1512_p0 = scmp.ge.s32.totalorder %s1902_s29, 1  ;;  %s1902_s29 = sphi %s1957_s29, %s20_s29  }
   0x4   : > { %p224_p1 = scmp.lt.s32.totalorder %s1902_s29, 3  ;;  %s1904_s9 = smov [#allocation5]  }
   0x5   : > { %s251_s10 = sshll.u32 %s1904_s9, 4  ;;  %p1789_p3 = scmp.eq.s32.totalorder %s1963_s30, 0  ;;  %s252_s10 = int_to_ptr.vmem [resolvable:$true] %s251_s10 }
   0x6   : > { %p1967_p2 = pnand %p1512_p0, %p224_p1  ;;  %s1877_s11 = scalar_lea.vmem %s252_s10, 2048 }
   0x7   : > { %p1878_p7 = scmp.ne.s32.totalorder %s252_s10, %s1877_s11  ;;  %p1885_p10 = scmp.lt.s32.totalorder %s252_s10, %s252_s10 }
   0x8   : > { %p1785_p4 = pneg %p1967_p2  ;;  %p1886_p11 = scmp.lt.s32.totalorder %s1877_s11, %s1877_s11 }
   0xa   : > { %p1786_p5 = pnand %p1789_p3, %p1785_p4  ;;  %p1887_p12 = por %p1886_p11, %p1885_p10 }
   0xc   : > { %p1868_p6 = pneg %p1786_p5 }
   0xe   : > { %p1880_p8 = pnand %p1878_p7, %p1868_p6 }
  0x10   : > { %p1881_p9 = pneg %p1880_p8 }
  0x12   : > { %p1888_p13 = pnand %p1887_p12, %p1881_p9 }
  0x14   : > { %1891 = shalt.err (!%p1888_p13)
}
  0x15   : > { %s1905_s12 = smov 128   ;;  %s1906_s13 = smov 8  }
  0x16   : > { %1788 = dma.hbm_to_vmem [thread:$0]  (!%p1786_p5), %s2304_s6, 2048, %s252_s10, [#allocation6], %s1905_s12, %s1905_s12, %s1906_s13  }
  0x17   : > { %279 = sbr.rel (%p1967_p2) target bundleno = 1015 (0x3f7), region = 52 }
  0x1c   : > { %1897 = dma.done.wait (%p1789_p3), [#allocation6], 2048  }
  0x1d   : > { %1899 = vsyncadd (%p1789_p3), [#allocation6], 4294965248  ;;  %s314_s16 = smul.u32 12, %s1963_s30  ;;  %v1804_v0 = vld [vmem:[%s2299_s1 + $0x38] sm:$0xff]   ;;  %v1805_v1 = vld [vmem:[%s2299_s1 + $0x30] sm:$0xff]   ;;  %vm798_vm1 = vcmask 1046528  }
  0x1e   : > { %1657 = vmatprep.subr.bf16.mxu0 %v1804_v0  ;;  %v1807_v2 = vld [vmem:[%s2299_s1 + $0x78] sm:$0xff]   ;;  %v1806_v3 = vld [vmem:[%s2299_s1 + $0x28] sm:$0xff]   ;;  %v1809_v4 = vld [vmem:[%s2299_s1 + $0x70] sm:$0xff]   ;;  %vm562_vm0 = vsmask.f32 7424  ;;  %s969_s27 = sld [smem:[#allocation4]] }
  0x1f   : > { %p315_p0 = scmp.lt.s32.totalorder %s314_s16, 23  ;;  %1658 = vmatpush3.bf16.msra.mxu0 %v1804_v0  ;;  %1685 = vmatprep.subr.bf16.mxu1 %v1807_v2  ;;  %v1811_v5 = vld [vmem:[%s2299_s1 + $0x68] sm:$0xff]   ;;  %v1808_v6 = vld [vmem:[%s2299_s1 + $0x20] sm:$0xff]   ;;  %v1810_v8 = vld [vmem:[%s2299_s1 + $0x18] sm:$0xff]  }
  0x20   : > { %1659 = vmatprep.subr.bf16.mxu0 %v1805_v1  ;;  %1686 = vmatpush3.bf16.msra.mxu1 %v1807_v2  ;;  %v1813_v7 = vld [vmem:[%s2299_s1 + $0x60] sm:$0xff]   ;;  %v1815_v9 = vld [vmem:[%s2299_s1 + $0x58] sm:$0xff]   ;;  %v1812_v12 = vld [vmem:[%s2299_s1 + $0x10] sm:$0xff]  }
  0x21   : > { %s2309_s16 = smov (!%p315_p0, %s314_s16), 23  ;;  %1687 = vmatprep.subr.bf16.mxu1 %v1809_v4  ;;  %v1817_v16 = vld [vmem:[%s2299_s1 + $0x50] sm:$0xff]   ;;  %v1814_v18 = vld [vmem:[%s2299_s1 + $0x8] sm:$0xff]   ;;  %v1816_v25 = vld [vmem:[%s2299_s1] sm:$0xff]  }
  0x22   : > { %s1517_s3 = sshll.u32 %s2309_s16, 2  ;;  %v1820_v22 = vld [vmem:[%s2299_s1 + $0x48] sm:$0xff]   ;;  %v1822_v27 = vld [vmem:[%s2299_s1 + $0x40] sm:$0xff]   ;;  %v1821_v31 = vld [vmem:[%s2299_s1 + $0xb8] sm:$0xff]  }
  0x23   : > { %1660 = vmatpush3.bf16.msra.mxu0 %v1805_v1  ;;  %s2013_s15 = scalar_lea.vmem %s2298_s0, %s1517_s3  ;;  %v1823_v34 = vld [vmem:[%s2299_s1 + $0xb0] sm:$0xff]   ;;  %v1825_v45 = vld [vmem:[%s2299_s1 + $0xa8] sm:$0xff]   ;;  %v1827_v50 = vld [vmem:[%s2299_s1 + $0xa0] sm:$0xff]  }
  0x24   : > { %1661 = vmatprep.subr.bf16.mxu0 %v1806_v3  ;;  %1688 = vmatpush3.bf16.msra.mxu1 %v1809_v4  ;;  %v2022_v10 = vld [vmem:[%s2013_s15] sm:$0xff]   ;;  %v2025_v11 = vld [vmem:[%s2013_s15 + $0x8] sm:$0xff]   ;;  %v2041_v21 = vld [vmem:[%s2013_s15 + $0x10] sm:$0xff]  }
  0x25   : > { %1689 = vmatprep.subr.bf16.mxu1 %v1811_v5  ;;  %1673 = vmatprep.mubr.bf16.mxu0 %v2022_v10  ;;  %v564_v13 = vshrl.u32 %v2022_v10, 16  ;;  %v566_v14 = vshll.u32 %v2022_v10, 16  ;;  %v571_v15 = vshll.u32 %v2025_v11, 16  ;;  %v2048_v24 = vld [vmem:[%s2013_s15 + $0x18] sm:$0xff]   ;;  %v579_v26 = vshll.u32 %v2041_v21, 16  ;;  %v2064_v33 = vld [vmem:[%s2013_s15 + $0x20] sm:$0xff]  }
  0x26   : > { %v575_v28 = vshrl.u32 %v2025_v11, 16  ;;  %v583_v29 = vshrl.u32 %v2041_v21, 16  ;;  %v587_v30 = vshll.u32 %v2048_v24, 16  ;;  %v2070_v36 = vld [vmem:[%s2013_s15 + $0x28] sm:$0xff]   ;;  %v595_v39 = vshll.u32 %v2064_v33, 16  ;;  %v1828_v53 = vld [vmem:[%s2299_s1 + $0x98] sm:$0xff]  }
  0x27   : > { %1662 = vmatpush3.bf16.msra.mxu0 %v1806_v3  ;;  %v568_v17 = vrot.slane %v566_v14, 1  ;;  %v573_v19 = vrot.slane %v571_v15, 1  ;;  %v581_v32 = vrot.slane %v579_v26, 1  ;;  %v591_v41 = vshrl.u32 %v2048_v24, 16  ;;  %v1831_v57 = vld [vmem:[%s2299_s1 + $0x90] sm:$0xff]   ;;  %v1832_v60 = vld [vmem:[%s2299_s1 + $0x88] sm:$0xff]  }
  0x28   : > { %1663 = vmatprep.subr.bf16.mxu0 %v1808_v6  ;;  %1690 = vmatpush3.bf16.msra.mxu1 %v1811_v5  ;;  %v589_v38 = vrot.slane %v587_v30, 1  ;;  %v599_v43 = vshrl.u32 %v2064_v33, 16  ;;  %v603_v44 = vshll.u32 %v2070_v36, 16  ;;  %v597_v46 = vrot.slane %v595_v39, 1  ;;  %v1833_v61 = vld [vmem:[%s2299_s1 + $0x80] sm:$0xff]  }
  0x29   : > { %1691 = vmatprep.subr.bf16.mxu1 %v1813_v7  ;;  %v569_v20 = vor.u32 %v568_v17, %v564_v13  ;;  %v577_v35 = vor.u32 %v575_v28, %v573_v19  ;;  %v585_v37 = vor.u32 %v583_v29, %v581_v32  ;;  %v799_v54 = vrot.slane %v2022_v10, 1 }
  0x2a   : > { %v593_v47 = vor.u32 %v591_v41, %v589_v38  ;;  %v601_v48 = vor.u32 %v599_v43, %v597_v46  ;;  %v605_v49 = vrot.slane %v603_v44, 1  ;;  %v800_v55 = vrot.slane %v2025_v11, 1 }
  0x2b   : > { %1664 = vmatpush3.bf16.msra.mxu0 %v1808_v6  ;;  %v574_v23 = vsel %vm562_vm0, %v569_v20, %v573_v19  ;;  %v582_v40 = vsel %vm562_vm0, %v577_v35, %v581_v32  ;;  %v590_v42 = vsel %vm562_vm0, %v585_v37, %v589_v38  ;;  %v607_v56 = vshrl.u32 %v2070_v36, 16 }
  0x2c   : > { %1665 = vmatprep.subr.bf16.mxu0 %v1810_v8  ;;  %1692 = vmatpush3.bf16.msra.mxu1 %v1813_v7  ;;  %v598_v51 = vsel %vm562_vm0, %v593_v47, %v597_v46  ;;  %v606_v52 = vsel %vm562_vm0, %v601_v48, %v605_v49  ;;  %v801_v58 = vsel %vm798_vm1, %v799_v54, %v800_v55  ;;  %v802_v62 = vrot.slane %v2041_v21, 1 }
  0x2d   : > { %1693 = vmatprep.subr.bf16.mxu1 %v1815_v9  ;;  %1701 = vmatprep.mubr.bf16.mxu1 %v574_v23  ;;  %v609_v59 = vor.u32 %v607_v56, %v605_v49  ;;  %v804_v63 = vrot.slane %v2048_v24, 1  ;;  %v806_v2 = vrot.slane %v2064_v33, 1  ;;  %v808_v3 = vrot.slane %v2070_v36, 1 }
  0x2e   : > { %v803_v0 = vsel %vm798_vm1, %v800_v55, %v802_v62  ;;  %v2123_v41 = vstv %s969_s27  ;;  %s1518_s27 = sshll.u32 %s1963_s30, 2 }
  0x2f   : > { %1666 = vmatpush3.bf16.msra.mxu0 %v1810_v8  ;;  %v805_v1 = vsel %vm798_vm1, %v802_v62, %v804_v63  ;;  %v807_v4 = vsel %vm798_vm1, %v804_v63, %v806_v2  ;;  %v809_v5 = vsel %vm798_vm1, %v806_v2, %v808_v3  ;;  %p321_p1 = scmp.lt.s32.totalorder %s1518_s27, 7 }
  0x30   : > { %1667 = vmatprep.subr.bf16.mxu0 %v1812_v12  ;;  %1694 = vmatpush3.bf16.msra.mxu1 %v1815_v9 }
  0x31   : > { %1695 = vmatprep.subr.bf16.mxu1 %v1817_v16  ;;  %s2311_s27 = smov (!%p321_p1, %s1518_s27), 7 }
  0x33   : > { %1668 = vmatpush3.bf16.msra.mxu0 %v1812_v12 }
  0x34   : > { %1669 = vmatprep.subr.bf16.mxu0 %v1814_v18  ;;  %1696 = vmatpush3.bf16.msra.mxu1 %v1817_v16 }
  0x35   : > { %1697 = vmatprep.subr.bf16.mxu1 %v1820_v22 }
  0x37   : > { %1670 = vmatpush3.bf16.msra.mxu0 %v1814_v18 }
  0x38   : > { %1671 = vmatprep.subr.bf16.mxu0 %v1816_v25  ;;  %1698 = vmatpush3.bf16.msra.mxu1 %v1820_v22 }
  0x39   : > { %1699 = vmatprep.subr.bf16.mxu1 %v1822_v27 }
  0x3b   : > { %1672 = vmatpush3.bf16.msra.mxu0 %v1816_v25 }
  0x3c   : > { %1713 = vmatprep.subr.bf16.mxu0 %v1821_v31  ;;  %1700 = vmatpush3.bf16.msra.mxu1 %v1822_v27 }
  0x3e   : > { %1674 = vmatmul.mubr.bf16.vlgmr.msra.gmra.mxu0 %v2025_v11 }
  0x3f   : > { %1714 = vmatpush3.bf16.msra.mxu0 %v1821_v31  ;;  %1677 = vmatprep.mubr.bf16.mxu0 %v2041_v21 }
  0x40   : > { %1715 = vmatprep.subr.bf16.mxu0 %v1823_v34  ;;  %1702 = vmatmul.mubr.bf16.vlgmr.msra.gmra.mxu1 %v582_v40 }
  0x41   : > { %1705 = vmatprep.mubr.bf16.mxu1 %v590_v42 }
  0x43   : > { %1716 = vmatpush3.bf16.msra.mxu0 %v1823_v34  ;;  %v2120_v34 = vld [vmem:[%s2300_s2] ss:$0 sm:$0xff] }
  0x44   : > { %1717 = vmatprep.subr.bf16.mxu0 %v1825_v45 }
  0x46   : > { %1678 = vmatmul.mubr.bf16.gmra.mxu0 %v2048_v24 }
  0x47   : > { %1718 = vmatpush3.bf16.msra.mxu0 %v1825_v45  ;;  %1681 = vmatprep.mubr.bf16.mxu0 %v2064_v33 }
  0x48   : > { %1719 = vmatprep.subr.bf16.mxu0 %v1827_v50  ;;  %1706 = vmatmul.mubr.bf16.gmra.mxu1 %v598_v51 }
  0x49   : > { %1709 = vmatprep.mubr.bf16.mxu1 %v606_v52 }
  0x4b   : > { %1720 = vmatpush3.bf16.msra.mxu0 %v1827_v50 }
  0x4c   : > { %1721 = vmatprep.subr.bf16.mxu0 %v1828_v53 }
  0x4e   : > { %1682 = vmatmul.mubr.bf16.gmra.mxu0 %v2070_v36 }
  0x4f   : > { %1722 = vmatpush3.bf16.msra.mxu0 %v1828_v53  ;;  %1729 = vmatprep.mubr.bf16.mxu0 %v801_v58 }
  0x50   : > { %1723 = vmatprep.subr.bf16.mxu0 %v1831_v57  ;;  %1710 = vmatmul.mubr.bf16.gmra.mxu1 %v609_v59 }
  0x53   : > { %1724 = vmatpush3.bf16.msra.mxu0 %v1831_v57 }
  0x54   : > { %1725 = vmatprep.subr.bf16.mxu0 %v1832_v60 }
  0x57   : > { %1726 = vmatpush3.bf16.msra.mxu0 %v1832_v60 }
  0x58   : > { %1727 = vmatprep.subr.bf16.mxu0 %v1833_v61 }
  0x5b   : > { %1728 = vmatpush3.bf16.msra.mxu0 %v1833_v61 }
  0x5e   : > { %1730 = vmatmul.mubr.bf16.vlgmr.msra.gmra.mxu0 %v803_v0 }
  0x5f   : > { %1733 = vmatprep.mubr.bf16.mxu0 %v805_v1 }
  0x66   : > { %1734 = vmatmul.mubr.bf16.gmra.mxu0 %v807_v4 }
  0x67   : > { %1737 = vmatprep.mubr.bf16.mxu0 %v809_v5 }
  0x6e   : > { %1738 = vmatmul.mubr.bf16.gmra.mxu0 %v808_v3 }
  0xfe   : > { %v1675_v6 = vpop.f32.mrf.mxu0 }
 0x100   : > { %v474_v7 = vpop.f32.mrf.mxu0  ;;  %v1703_v8 = vpop.f32.mrf.mxu1 }
 0x102   : > { %v1676_v9 = vpop.f32.mrf.mxu0  ;;  %v698_v10 = vpop.f32.mrf.mxu1 }
 0x103   : > { %v745_v32 = vadd.f32 %v698_v10, %v474_v7 }
 0x104   : > { %v477_v11 = vpop.f32.mrf.mxu0  ;;  %v1704_v12 = vpop.f32.mrf.mxu1 }
 0x105   : > { %v748_v35 = vadd.f32 %v1704_v12, %v1676_v9 }
 0x106   : > { %v1679_v13 = vpop.f32.mrf.mxu0  ;;  %v701_v14 = vpop.f32.mrf.mxu1 }
 0x107   : > { %v746_v38 = vadd.f32 %v701_v14, %v477_v11 }
 0x108   : > { %v490_v15 = vpop.f32.mrf.mxu0  ;;  %v1707_v16 = vpop.f32.mrf.mxu1 }
 0x109   : > { %v751_v43 = vadd.f32 %v1707_v16, %v1679_v13 }
 0x10a   : > { %v1680_v17 = vpop.f32.mrf.mxu0  ;;  %v714_v18 = vpop.f32.mrf.mxu1 }
 0x10b   : > { %v749_v48 = vadd.f32 %v714_v18, %v490_v15 }
 0x10c   : > { %v493_v19 = vpop.f32.mrf.mxu0  ;;  %v1708_v20 = vpop.f32.mrf.mxu1 }
 0x10d   : > { %v752_v52 = vadd.f32 %v1708_v20, %v1680_v17 }
 0x10e   : > { %v1683_v21 = vpop.f32.mrf.mxu0  ;;  %v717_v22 = vpop.f32.mrf.mxu1 }
 0x110   : > { %v506_v23 = vpop.f32.mrf.mxu0  ;;  %v1711_v25 = vpop.f32.mrf.mxu1 }
 0x111   : > { %v755_v62 = vadd.f32 %v1711_v25, %v1683_v21 }
 0x112   : > { %v1684_v24 = vpop.f32.mrf.mxu0  ;;  %v730_v26 = vpop.f32.mrf.mxu1 }
 0x113   : > { %532 = vst [vmem:[#allocation2 + $0x40] sm:$0x3f] %v1684_v24 }
 0x114   : > { %v1712_v28 = vpop.f32.mrf.mxu1  ;;  %v2115_v30 = vpop.f32.mrf.mxu0 }
 0x116   : > { %v733_v11 = vpop.f32.mrf.mxu1 }
 0x117   : > { %v754_v21 = vadd.f32 %v733_v11, %v2115_v30 }
 0x11a   : > { %v544_v27 = vld [vmem:[#allocation2 + $0x40] sm:$0x3f] }
 0x11b   : > { %v756_v29 = vadd.f32 %v1712_v28, %v544_v27 }
 0x11d   : > { %768 = vst [vmem:[#allocation2 + $0x40] sm:$0x3f] %v756_v29 }
 0x11e   : > { %v1731_v31 = vpop.f32.mrf.mxu0 }
 0x120   : > { %v898_v33 = vpop.f32.mrf.mxu0 }
 0x121   : > { %v945_v36 = vadd.f32 %v898_v33, %v745_v32 }
 0x122   : > { %v1732_v37 = vpop.f32.mrf.mxu0 }
 0x123   : > { %v948_v39 = vadd.f32 %v1732_v37, %v748_v35  ;;  %v983_v40 = vadd.f32 %v2120_v34, %v945_v36 }
 0x124   : > { %v901_v42 = vpop.f32.mrf.mxu0  ;;  %v780_v18 = vld [vmem:[#allocation2 + $0x40] sm:$0x3f] }
 0x125   : > { %v946_v44 = vadd.f32 %v901_v42, %v746_v38  ;;  %v988_v46 = vmul.f32 %v2123_v41, %v983_v40  ;;  %v1037_v47 = vadd.f32 %v2120_v34, %v948_v39  ;;  %vm985_vm2 = vcmp.ge.f32.partialorder %v983_v40, 0.0  ;;  %v1836_v42 = vld [vmem:[#allocation5 + $0x74] ss:$8 sps:$4 sm:$0xff]  }
 0x126   : > { %v1735_v45 = vpop.f32.mrf.mxu0  ;;  %1308 = vmatprep.subr.bf16.mxu0 %v1836_v42  ;;  %1741 = vmatprep.subr.bf16.mxu1 %v1836_v42 }
 0x127   : > { %v951_v49 = vadd.f32 %v1735_v45, %v751_v43  ;;  %v984_v50 = vadd.f32 %v2120_v34, %v946_v44  ;;  %v2129_v56 = vsel %vm985_vm2, %v983_v40, %v988_v46  ;;  %v1041_v57 = vmul.f32 %v1037_v47, %v2123_v41  ;;  %v1834_v40 = vld [vmem:[#allocation5 + $0x70] ss:$8 sps:$4 sm:$0xff]   ;;  %v1837_v43 = vld [vmem:[#allocation5 + $0x60] ss:$8 sps:$4 sm:$0xff]   ;;  %v1842_v44 = vld [vmem:[#allocation5 + $0x54] ss:$8 sps:$4 sm:$0xff]  }
 0x128   : > { %v914_v51 = vpop.f32.mrf.mxu0  ;;  %vm1039_vm4 = vcmp.ge.f32.partialorder %v1037_v47, 0.0  ;;  %v1002_v5 = vmul.f32 %v2129_v56, %v2129_v56  ;;  %1309 = vmatpush1.bf16.msra.mxu0 %v1834_v40  ;;  %1749 = vmatpush1.bf16.msra.mxu1 %v1834_v40  ;;  %v1840_v45 = vld [vmem:[#allocation5 + $0x50] ss:$8 sps:$4 sm:$0xff]   ;;  %v1845_v46 = vld [vmem:[#allocation5 + $0x44] ss:$8 sps:$4 sm:$0xff]  }
 0x129   : > { %v949_v53 = vadd.f32 %v914_v51, %v749_v48  ;;  %vm986_vm3 = vcmp.ge.f32.partialorder %v984_v50, 0.0  ;;  %v989_v54 = vmul.f32 %v2123_v41, %v984_v50  ;;  %v1090_v58 = vadd.f32 %v2120_v34, %v951_v49  ;;  %v1848_v48 = vld [vmem:[#allocation5 + $0x34] ss:$8 sps:$4 sm:$0xff]   ;;  %v1846_v49 = vld [vmem:[#allocation5 + $0x30] ss:$8 sps:$4 sm:$0xff]  }
 0x12a   : > { %v1736_v55 = vpop.f32.mrf.mxu0  ;;  %v2144_v6 = vsel %vm1039_vm4, %v1037_v47, %v1041_v57  ;;  %v1843_v47 = vld [vmem:[#allocation5 + $0x40] ss:$8 sps:$4 sm:$0xff]  }
 0x12b   : > { %v952_v59 = vadd.f32 %v1736_v55, %v752_v52  ;;  %v2133_v60 = vsel %vm986_vm3, %v984_v50, %v989_v54  ;;  %v1038_v61 = vadd.f32 %v2120_v34, %v949_v53  ;;  %v1094_v7 = vmul.f32 %v1090_v58, %v2123_v41  ;;  %v1851_v50 = vld [vmem:[#allocation5 + $0x24] ss:$8 sps:$4 sm:$0xff]   ;;  %v1849_v51 = vld [vmem:[#allocation5 + $0x20] ss:$8 sps:$4 sm:$0xff]  }
 0x12c   : > { %v917_v63 = vpop.f32.mrf.mxu0  ;;  %v992_v0 = vadd.f32 %v2133_v60, %v2129_v56  ;;  %v1003_v1 = vmul.f32 %v2133_v60, %v2133_v60  ;;  %vm1092_vm7 = vcmp.ge.f32.partialorder %v1090_v58, 0.0  ;;  %v1055_v20 = vmul.f32 %v2144_v6, %v2144_v6 }
 0x12d   : > { %vm1040_vm5 = vcmp.ge.f32.partialorder %v1038_v61, 0.0  ;;  %v1042_v2 = vmul.f32 %v1038_v61, %v2123_v41  ;;  %v1091_v3 = vadd.f32 %v2120_v34, %v952_v59  ;;  %v2160_v23 = vsel %vm1092_vm7, %v1090_v58, %v1094_v7  ;;  %v1857_v7 = vld [vmem:[#allocation5 + $0x4] ss:$8 sps:$4 sm:$0xff]  }
 0x12e   : > { %v1739_v4 = vpop.f32.mrf.mxu0  ;;  %993 = vadd.xlane.f32.xlu0 %v992_v0  ;;  %v1004_v13 = vadd.f32 %v1003_v1, %v1002_v5  ;;  %v1108_v30 = vmul.f32 %v2160_v23, %v2160_v23 }
 0x12f   : > { %v955_v8 = vadd.f32 %v1739_v4, %v755_v62  ;;  %v2147_v9 = vsel %vm1040_vm5, %v1038_v61, %v1042_v2  ;;  %vm1093_vm6 = vcmp.ge.f32.partialorder %v1091_v3, 0.0  ;;  %v1095_v10 = vmul.f32 %v1091_v3, %v2123_v41  ;;  %v1854_v2 = vld [vmem:[#allocation5 + $0x14] ss:$8 sps:$4 sm:$0xff]   ;;  %v1852_v4 = vld [vmem:[#allocation5 + $0x10] ss:$8 sps:$4 sm:$0xff]  }
 0x130   : > { %v930_v12 = vpop.f32.mrf.mxu0  ;;  %v1045_v14 = vadd.f32 %v2147_v9, %v2144_v6  ;;  %v1056_v15 = vmul.f32 %v2147_v9, %v2147_v9 }
 0x131   : > { %v2154_v16 = vsel %vm1093_vm6, %v1091_v3, %v1095_v10  ;;  %v1144_v17 = vadd.f32 %v2120_v34, %v955_v8  ;;  %v1855_v8 = vld [vmem:[#allocation5] ss:$8 sps:$4 sm:$0xff]   ;;  %v1907_v10 = vmov 0  }
 0x132   : > { %v1740_v19 = vpop.f32.mrf.mxu0  ;;  %1005 = vadd.xlane.f32.xlu0 %v1004_v13  ;;  %1046 = vadd.xlane.f32.xlu1 %v1045_v14  ;;  %v1057_v25 = vadd.f32 %v1056_v15, %v1055_v20  ;;  %v1098_v26 = vadd.f32 %v2154_v16, %v2160_v23  ;;  %v1109_v27 = vmul.f32 %v2154_v16, %v2154_v16 }
 0x133   : > { %v956_v22 = vadd.f32 %v1740_v19, %v780_v18  ;;  %v1148_v29 = vmul.f32 %v1144_v17, %v2123_v41  ;;  %vm1146_vm8 = vcmp.ge.f32.partialorder %v1144_v17, 0.0  ;;  %1340 = vmatprep.mubr.bf16.mxu0 %v1907_v10  ;;  %1350 = vmatprep.mubr.bf16.mxu1 %v1907_v10 }
 0x134   : > { %v933_v24 = vpop.f32.mrf.mxu0  ;;  %v1110_v32 = vadd.f32 %v1109_v27, %v1108_v30 }
 0x135   : > { %968 = vst [vmem:[#allocation2 + $0x40] sm:$0x3f] %v956_v22  ;;  %v954_v28 = vadd.f32 %v933_v24, %v754_v21  ;;  %v2171_v35 = vsel %vm1146_vm8, %v1144_v17, %v1148_v29 }
 0x136   : > { %1058 = vadd.xlane.f32.xlu1 %v1057_v25  ;;  %1099 = vadd.xlane.f32.xlu0 %v1098_v26  ;;  %v1162_v39 = vmul.f32 %v2171_v35, %v2171_v35 }
 0x137   : > { %v1143_v31 = vadd.f32 %v2120_v34, %v954_v28 }
 0x139   : > { %vm1145_vm9 = vcmp.ge.f32.partialorder %v1143_v31, 0.0  ;;  %v1147_v33 = vmul.f32 %v1143_v31, %v2123_v41  ;;  %v1839_v41 = vld [vmem:[#allocation5 + $0x64] ss:$8 sps:$4 sm:$0xff]  }
 0x13a   : > { %1111 = vadd.xlane.f32.xlu1 %v1110_v32  ;;  %1310 = vmatprep.subr.bf16.mxu0 %v1839_v41 }
 0x13b   : > { %v2173_v36 = vsel %vm1145_vm9, %v1143_v31, %v1147_v33  ;;  %1742 = vmatprep.subr.bf16.mxu1 %v1839_v41  ;;  %1311 = vmatpush1.bf16.msra.mxu0 %v1837_v43  ;;  %v2188_v33 = vld [vmem:[%s2302_s4] sm:$0xff] }
 0x13c   : > { %v1151_v37 = vadd.f32 %v2171_v35, %v2173_v36  ;;  %v1161_v38 = vmul.f32 %v2173_v36, %v2173_v36  ;;  %1750 = vmatpush1.bf16.msra.mxu1 %v1837_v43  ;;  %1312 = vmatprep.subr.bf16.mxu0 %v1842_v44 }
 0x13d   : > { %1743 = vmatprep.subr.bf16.mxu1 %v1842_v44 }
 0x13e   : > { %1152 = vadd.xlane.f32.xlu0 %v1151_v37  ;;  %v1163_v34 = vadd.f32 %v1162_v39, %v1161_v38  ;;  %v2193_v37 = vld [vmem:[%s2302_s4 + $0x8] sm:$0xff] }
 0x13f   : > { %1313 = vmatpush1.bf16.msra.mxu0 %v1840_v45 }
 0x140   : > { %1164 = vadd.xlane.f32.xlu1 %v1163_v34  ;;  %1751 = vmatpush1.bf16.msra.mxu1 %v1840_v45 }
 0x141   : > { %1314 = vmatprep.subr.bf16.mxu0 %v1845_v46  ;;  %1744 = vmatprep.subr.bf16.mxu1 %v1845_v46 }
 0x143   : > { %1315 = vmatpush1.bf16.msra.mxu0 %v1843_v47 }
 0x144   : > { %1752 = vmatpush1.bf16.msra.mxu1 %v1843_v47  ;;  %1316 = vmatprep.subr.bf16.mxu0 %v1848_v48 }
 0x145   : > { %1745 = vmatprep.subr.bf16.mxu1 %v1848_v48 }
 0x147   : > { %1317 = vmatpush1.bf16.msra.mxu0 %v1846_v49 }
 0x148   : > { %1753 = vmatpush1.bf16.msra.mxu1 %v1846_v49  ;;  %1318 = vmatprep.subr.bf16.mxu0 %v1851_v50 }
 0x149   : > { %1746 = vmatprep.subr.bf16.mxu1 %v1851_v50 }
 0x14b   : > { %1319 = vmatpush1.bf16.msra.mxu0 %v1849_v51 }
 0x14c   : > { %1754 = vmatpush1.bf16.msra.mxu1 %v1849_v51  ;;  %1320 = vmatprep.subr.bf16.mxu0 %v1854_v2 }
 0x14d   : > { %1747 = vmatprep.subr.bf16.mxu1 %v1854_v2 }
 0x14f   : > { %1321 = vmatpush1.bf16.msra.mxu0 %v1852_v4 }
 0x150   : > { %1755 = vmatpush1.bf16.msra.mxu1 %v1852_v4  ;;  %1322 = vmatprep.subr.bf16.mxu0 %v1857_v7 }
 0x151   : > { %1748 = vmatprep.subr.bf16.mxu1 %v1857_v7 }
 0x153   : > { %1323 = vmatpush1.bf16.msra.mxu0 %v1855_v8 }
 0x154   : > { %1756 = vmatpush1.bf16.msra.mxu1 %v1855_v8 }
 0x1b7   : > { %v994_v52 = vpop.xlane.xlu0 %993 }
 0x1b8   : > { %v995_v53 = vrot.slane %v994_v52, 4 }
 0x1ba   : > { %v996_v54 = vadd.f32 %v995_v53, %v994_v52 }
 0x1bb   : > { %v1006_v55 = vpop.xlane.xlu0 %1005  ;;  %v1047_v11 = vpop.xlane.xlu1 %1046 }
 0x1bc   : > { %v997_v57 = vrot.slane %v996_v54, 2  ;;  %v1007_v58 = vrot.slane %v1006_v55, 4  ;;  %v1048_v13 = vrot.slane %v1047_v11, 4 }
 0x1be   : > { %v1008_v59 = vadd.f32 %v1007_v58, %v1006_v55  ;;  %v998_v61 = vadd.f32 %v997_v57, %v996_v54  ;;  %v1049_v15 = vadd.f32 %v1048_v13, %v1047_v11 }
 0x1bf   : > { %v1059_v12 = vpop.xlane.xlu1 %1058  ;;  %v1100_v32 = vpop.xlane.xlu0 %1099 }
 0x1c0   : > { %v1009_v62 = vrot.slane %v1008_v59, 2  ;;  %v999_v63 = vrot.slane %v998_v61, 1  ;;  %v1060_v14 = vrot.slane %v1059_v12, 4  ;;  %v1050_v19 = vrot.slane %v1049_v15, 2 }
 0x1c1   : > { %v1101_v42 = vrot.slane %v1100_v32, 4 }
 0x1c2   : > { %v1010_v0 = vadd.f32 %v1009_v62, %v1008_v59  ;;  %v1000_v1 = vadd.f32 %v999_v63, %v998_v61  ;;  %v1061_v17 = vadd.f32 %v1060_v14, %v1059_v12  ;;  %v1051_v21 = vadd.f32 %v1050_v19, %v1049_v15 }
 0x1c3   : > { %v1112_v39 = vpop.xlane.xlu1 %1111  ;;  %v1102_v47 = vadd.f32 %v1101_v42, %v1100_v32 }
 0x1c4   : > { %v1011_v3 = vrot.slane %v1010_v0, 1  ;;  %1757 = vpush %v1000_v1  ;;  %v1062_v20 = vrot.slane %v1061_v17, 2  ;;  %v1052_v24 = vrot.slane %v1051_v21, 1  ;;  %v1113_v44 = vrot.slane %v1112_v39, 4 }
 0x1c5   : > { %v1103_v51 = vrot.slane %v1102_v47, 2 }
 0x1c6   : > { %v1012_v5 = vadd.f32 %v1011_v3, %v1010_v0  ;;  %v1063_v22 = vadd.f32 %v1062_v20, %v1061_v17  ;;  %v1053_v27 = vadd.f32 %v1052_v24, %v1051_v21  ;;  %v1114_v49 = vadd.f32 %v1113_v44, %v1112_v39 }
 0x1c7   : > { %v1104_v53 = vadd.f32 %v1103_v51, %v1102_v47  ;;  %v1153_v0 = vpop.xlane.xlu0 %1152 }
 0x1c8   : > { %1759 = vpush %v1012_v5  ;;  %v1064_v25 = vrot.slane %v1063_v22, 1  ;;  %v1115_v52 = vrot.slane %v1114_v49, 2  ;;  %v1154_v5 = vrot.slane %v1153_v0, 4 }
 0x1c9   : > { %v1105_v55 = vrot.slane %v1104_v53, 1  ;;  %v1165_v2 = vpop.xlane.xlu1 %1164 }
 0x1ca   : > { %v1065_v28 = vadd.f32 %v1064_v25, %v1063_v22  ;;  %v1116_v54 = vadd.f32 %v1115_v52, %v1114_v49  ;;  %v1155_v12 = vadd.f32 %v1154_v5, %v1153_v0 }
 0x1cb   : > { %v1106_v59 = vadd.f32 %v1105_v55, %v1104_v53 }
 0x1cc   : > { %v1117_v57 = vrot.slane %v1116_v54, 1 }
 0x1ce   : > { %v1118_v61 = vadd.f32 %v1117_v57, %v1116_v54 }
 0x1f5   : > { %s1758_s10 = spop %1757 }
 0x1f6   : > { %s1014_s3 = smul.f32 0.00048828125, %s1758_s10 }
 0x1f8   : > { %s1016_s11 = smul.f32 %s1014_s3, %s1014_s3  ;;  %v1018_v29 = vstv %s1014_s3 }
 0x1f9   : > { %s1760_s12 = spop %1759  ;;  %v1019_v30 = vsub.f32 %v2129_v56, %v1018_v29  ;;  %v1020_v31 = vsub.f32 %v2133_v60, %v1018_v29  ;;  %v2200_v56 = vld [vmem:[%s2303_s5] sm:$0xff]  ;;  %v2205_v60 = vld [vmem:[%s2303_s5 + $0x8] sm:$0xff] }
 0x1fa   : > { %s1015_s13 = smul.f32 0.00048828125, %s1760_s12 }
 0x1fc   : > { %s1017_s14 = ssub.f32 %s1015_s13, %s1016_s11 }
 0x1fe   : > { %s1021_s15 = sadd.f32 1e-05, %s1017_s14 }
 0x200   : > { %v1022_v18 = vstv %s1021_s15 }
 0x201   : > { %1858 = vrsqrt.f32 %v1022_v18  ;;  %v1156_v18 = vrot.slane %v1155_v12, 2 }
 0x203   : > { %v1157_v21 = vadd.f32 %v1156_v18, %v1155_v12 }
 0x205   : > { %v1158_v25 = vrot.slane %v1157_v21, 1 }
 0x20e   : > { %v1859_v26 = vpop.eup %1858 }
 0x20f   : > { %1761 = vpush %v1859_v26 }
 0x210   : > { %1763 = vpush %v1053_v27 }
 0x211   : > { %1765 = vpush %v1065_v28  ;;  %v1159_v28 = vadd.f32 %v1158_v25, %v1157_v21 }
 0x240   : > { %s1762_s17 = spop %1761 }
 0x241   : > { %v1025_v38 = vstv %s1762_s17  ;;  %s1764_s21 = spop %1763 }
 0x242   : > { %v1026_v34 = vmul.f32 %v1025_v38, %v1019_v30  ;;  %v1027_v40 = vmul.f32 %v1025_v38, %v1020_v31  ;;  %s2195_s22 = smul.f32 0.00048828125, %s1764_s21  ;;  %s1766_s23 = spop %1765 }
 0x243   : > { %s1068_s28 = smul.f32 0.00048828125, %s1766_s23 }
 0x244   : > { %v1028_v41 = vmul.f32 %v1026_v34, %v2188_v33  ;;  %v1029_v43 = vmul.f32 %v1027_v40, %v2193_v37  ;;  %s1069_s9 = smul.f32 %s2195_s22, %s2195_s22  ;;  %v1071_v62 = vstv %s2195_s22 }
 0x245   : > { %v1072_v63 = vsub.f32 %v2144_v6, %v1071_v62  ;;  %v1073_v3 = vsub.f32 %v2147_v9, %v1071_v62  ;;  %v1166_v6 = vrot.slane %v1165_v2, 4  ;;  %v1908_v9 = vmov 0.0  }
 0x246   : > { %v1030_v45 = vadd.f32 %v1028_v41, %v2200_v56  ;;  %v1031_v46 = vadd.f32 %v1029_v43, %v2205_v60  ;;  %s1070_s10 = ssub.f32 %s1068_s28, %s1069_s9 }
 0x247   : > { %v1167_v15 = vadd.f32 %v1166_v6, %v1165_v2 }
 0x248   : > { %v1206_v48 = vpack.c.bf16 %v1031_v46, %v1030_v45  ;;  %s1074_s3 = sadd.f32 1e-05, %s1070_s10  ;;  %v1395_v45 = vlaneseq  ;;  %s1614_s10 = sshll.u32 %s2311_s27, 5 }
 0x249   : > { %v1168_v20 = vrot.slane %v1167_v15, 2 }
 0x24a   : > { %v1075_v50 = vstv %s1074_s3  ;;  %1341 = vmatmul.mubr.bf16.vlgmr.msra.gmra.mxu0 %v1206_v48  ;;  %v1396_v46 = vshrl.u32 %v1395_v45, 7  ;;  %v1393_v48 = vld [vmem:[%s2305_s7] sm:$0x3] }
 0x24b   : > { %1860 = vrsqrt.f32 %v1075_v50  ;;  %v1169_v24 = vadd.f32 %v1168_v20, %v1167_v15 }
 0x24c   : > { %v1397_v47 = vsub.s32 0, %v1396_v46  ;;  %v1401_v49 = vsub.s32 1, %v1396_v46 }
 0x24d   : > { %v1170_v26 = vrot.slane %v1169_v24, 1 }
 0x24e   : > { %v2244_v50 = vrot.slane %v1393_v48, %v1397_v47  ;;  %v2246_v51 = vrot.slane %v1393_v48, %v1401_v49 }
 0x24f   : > { %v1171_v29 = vadd.f32 %v1170_v26, %v1169_v24 }
 0x258   : > { %v1861_v58 = vpop.eup %1860 }
 0x259   : > { %1767 = vpush %v1861_v58 }
 0x25a   : > { %1769 = vpush %v1106_v59 }
 0x25b   : > { %1771 = vpush %v1118_v61 }
 0x28a   : > { %s1768_s11 = spop %1767 }
 0x28b   : > { %v1078_v1 = vstv %s1768_s11  ;;  %s1770_s12 = spop %1769 }
 0x28c   : > { %v1079_v4 = vmul.f32 %v1078_v1, %v1072_v63  ;;  %s2216_s13 = smul.f32 0.00048828125, %s1770_s12  ;;  %s1772_s14 = spop %1771  ;;  %v1080_v7 = vmul.f32 %v1078_v1, %v1073_v3 }
 0x28d   : > { %s1121_s15 = smul.f32 0.00048828125, %s1772_s14  ;;  %s2251_s12 = scalar_lea.vmem %s2306_s8, %s1614_s10 }
 0x28e   : > { %v1081_v8 = vmul.f32 %v1079_v4, %v2188_v33  ;;  %s1122_s17 = smul.f32 %s2216_s13, %s2216_s13  ;;  %v1082_v13 = vmul.f32 %v1080_v7, %v2193_v37  ;;  %v1124_v30 = vstv %s2216_s13 }
 0x28f   : > { %v1125_v31 = vsub.f32 %v2160_v23, %v1124_v30  ;;  %v1126_v32 = vsub.f32 %v2154_v16, %v1124_v30 }
 0x290   : > { %v1083_v11 = vadd.f32 %v1081_v8, %v2200_v56  ;;  %s1123_s18 = ssub.f32 %s1121_s15, %s1122_s17  ;;  %v1084_v19 = vadd.f32 %v1082_v13, %v2205_v60 }
 0x292   : > { %v1207_v14 = vpack.c.bf16 %v1083_v11, %v1908_v9  ;;  %s1127_s16 = sadd.f32 1e-05, %s1123_s18  ;;  %v1208_v22 = vpack.c.bf16 %v1908_v9, %v1084_v19 }
 0x294   : > { %v1128_v17 = vstv %s1127_s16  ;;  %1351 = vmatmul.mubr.bf16.vlgmr.msra.gmra.mxu1 %v1207_v14 }
 0x295   : > { %1862 = vrsqrt.f32 %v1128_v17  ;;  %1358 = vmatprep.mubr.bf16.mxu1 %v1907_v10 }
 0x29c   : > { %1359 = vmatmul.mubr.bf16.gmra.mxu1 %v1208_v22 }
 0x29d   : > { %1366 = vmatprep.mubr.bf16.mxu1 %v1907_v10 }
 0x2a2   : > { %v1863_v27 = vpop.eup %1862 }
 0x2a3   : > { %1773 = vpush %v1863_v27 }
 0x2a4   : > { %1775 = vpush %v1159_v28 }
 0x2a5   : > { %1777 = vpush %v1171_v29 }
 0x2d4   : > { %s1774_s19 = spop %1773 }
 0x2d5   : > { %v1131_v38 = vstv %s1774_s19  ;;  %s1776_s20 = spop %1775 }
 0x2d6   : > { %v1132_v39 = vmul.f32 %v1131_v38, %v1125_v31  ;;  %v1133_v34 = vmul.f32 %v1131_v38, %v1126_v32  ;;  %s2231_s21 = smul.f32 0.00048828125, %s1776_s20  ;;  %s1778_s22 = spop %1777 }
 0x2d7   : > { %s1174_s23 = smul.f32 0.00048828125, %s1778_s22 }
 0x2d8   : > { %v1134_v40 = vmul.f32 %v1132_v39, %v2188_v33  ;;  %v1135_v42 = vmul.f32 %v1133_v34, %v2193_v37  ;;  %s1175_s24 = smul.f32 %s2231_s21, %s2231_s21  ;;  %v1177_v62 = vstv %s2231_s21 }
 0x2d9   : > { %v1178_v63 = vsub.f32 %v2173_v36, %v1177_v62  ;;  %v1179_v1 = vsub.f32 %v2171_v35, %v1177_v62 }
 0x2da   : > { %v1136_v23 = vadd.f32 %v1134_v40, %v2200_v56  ;;  %v1137_v16 = vadd.f32 %v1135_v42, %v2205_v60  ;;  %s1176_s25 = ssub.f32 %s1174_s23, %s1175_s24 }
 0x2dc   : > { %s1180_s26 = sadd.f32 1e-05, %s1176_s25  ;;  %v1209_v41 = vpack.c.bf16 %v1137_v16, %v1136_v23 }
 0x2de   : > { %v1181_v43 = vstv %s1180_s26  ;;  %1367 = vmatmul.mubr.bf16.gmra.mxu1 %v1209_v41 }
 0x2df   : > { %1864 = vrsqrt.f32 %v1181_v43  ;;  %1376 = vmatprep.mubr.bf16.mxu1 %v1907_v10 }
 0x2ec   : > { %v1865_v44 = vpop.eup %1864 }
 0x2ed   : > { %1779 = vpush %v1865_v44 }
 0x30a   : > { %v1342_v52 = vpop.f32.mrf.mxu0 }
 0x30b   : > { %v1405_v53 = vadd.f32 %v2244_v50, %v1342_v52 }
 0x30c   : > { %v1344_v54 = vpop.f32.mrf.mxu0 }
 0x30d   : > { %1409 = vst [vmem:[%s2251_s12] sm:$0xff] %v1405_v53  ;;  %v1406_v55 = vadd.f32 %v2246_v51, %v1344_v54 }
 0x30e   : > { %v1346_v57 = vpop.f32.mrf.mxu0 }
 0x30f   : > { %1410 = vst [vmem:[%s2251_s12 + $0x8] sm:$0xff] %v1406_v55  ;;  %v1407_v58 = vadd.f32 %v2244_v50, %v1346_v57 }
 0x310   : > { %v1348_v59 = vpop.f32.mrf.mxu0 }
 0x311   : > { %1411 = vst [vmem:[%s2251_s12 + $0x10] sm:$0xff] %v1407_v58  ;;  %v1408_v61 = vadd.f32 %v2246_v51, %v1348_v59 }
 0x313   : > { %1412 = vst [vmem:[%s2251_s12 + $0x18] sm:$0xff] %v1408_v61 }
 0x31e   : > { %s1780_s30 = spop %1779 }
 0x31f   : > { %v1184_v0 = vstv %s1780_s30 }
 0x320   : > { %v1185_v2 = vmul.f32 %v1184_v0, %v1178_v63  ;;  %v1186_v3 = vmul.f32 %v1184_v0, %v1179_v1 }
 0x322   : > { %v1187_v4 = vmul.f32 %v1185_v2, %v2188_v33  ;;  %v1188_v7 = vmul.f32 %v1186_v3, %v2193_v37 }
 0x324   : > { %v1189_v5 = vadd.f32 %v1187_v4, %v2200_v56  ;;  %v1190_v36 = vadd.f32 %v1188_v7, %v2205_v60 }
 0x326   : > { %v1210_v8 = vpack.c.bf16 %v1189_v5, %v1908_v9  ;;  %v1211_v35 = vpack.c.bf16 %v1908_v9, %v1190_v36 }
 0x328   : > { %1377 = vmatmul.mubr.bf16.gmra.mxu1 %v1210_v8 }
 0x329   : > { %1384 = vmatprep.mubr.bf16.mxu1 %v1907_v10 }
 0x330   : > { %1385 = vmatmul.mubr.bf16.gmra.mxu1 %v1211_v35 }
 0x354   : > { %v1352_v6 = vpop.f32.mrf.mxu1 }
 0x356   : > { %v1353_v11 = vpop.f32.mrf.mxu1 }
 0x358   : > { %v1354_v33 = vpop.f32.mrf.mxu1 }
 0x359   : > { %v1413_v56 = vadd.f32 %v2244_v50, %v1354_v33 }
 0x35a   : > { %v1356_v12 = vpop.f32.mrf.mxu1 }
 0x35b   : > { %1600 = vst [vmem:[%s2251_s12 + $0x20] sm:$0xff] %v1413_v56  ;;  %v1414_v37 = vadd.f32 %v2246_v51, %v1356_v12 }
 0x35c   : > { %v1360_v13 = vpop.f32.mrf.mxu1 }
 0x35d   : > { %1601 = vst [vmem:[%s2251_s12 + $0x28] sm:$0xff] %v1414_v37  ;;  %v1415_v10 = vadd.f32 %v2244_v50, %v1360_v13 }
 0x35e   : > { %v1362_v60 = vpop.f32.mrf.mxu1 }
 0x35f   : > { %1602 = vst [vmem:[%s2251_s12 + $0x30] sm:$0xff] %v1415_v10  ;;  %v1416_v9 = vadd.f32 %v2246_v51, %v1362_v60 }
 0x360   : > { %v1364_v14 = vpop.f32.mrf.mxu1 }
 0x361   : > { %1603 = vst [vmem:[%s2251_s12 + $0x38] sm:$0xff] %v1416_v9 }
 0x362   : > { %v1365_v15 = vpop.f32.mrf.mxu1 }
 0x39e   : > { %v1368_v17 = vpop.f32.mrf.mxu1 }
 0x39f   : > { %v1422_v18 = vadd.f32 %v2244_v50, %v1368_v17 }
 0x3a0   : > { %v1370_v19 = vpop.f32.mrf.mxu1 }
 0x3a1   : > { %1604 = vst [vmem:[%s2251_s12 + $0x40] sm:$0xff] %v1422_v18  ;;  %v1423_v20 = vadd.f32 %v2246_v51, %v1370_v19 }
 0x3a2   : > { %v1372_v21 = vpop.f32.mrf.mxu1 }
 0x3a3   : > { %1605 = vst [vmem:[%s2251_s12 + $0x48] sm:$0xff] %v1423_v20  ;;  %v1424_v22 = vadd.f32 %v2244_v50, %v1372_v21 }
 0x3a4   : > { %v1374_v24 = vpop.f32.mrf.mxu1 }
 0x3a5   : > { %1606 = vst [vmem:[%s2251_s12 + $0x50] sm:$0xff] %v1424_v22  ;;  %v1425_v25 = vadd.f32 %v2246_v51, %v1374_v24 }
 0x3a7   : > { %1607 = vst [vmem:[%s2251_s12 + $0x58] sm:$0xff] %v1425_v25 }
 0x3e8   : > { %v1378_v26 = vpop.f32.mrf.mxu1 }
 0x3ea   : > { %v1379_v27 = vpop.f32.mrf.mxu1 }
 0x3ec   : > { %v1380_v28 = vpop.f32.mrf.mxu1 }
 0x3ed   : > { %v1431_v29 = vadd.f32 %v2244_v50, %v1380_v28 }
 0x3ee   : > { %v1382_v30 = vpop.f32.mrf.mxu1 }
 0x3ef   : > { %1608 = vst [vmem:[%s2251_s12 + $0x60] sm:$0xff] %v1431_v29  ;;  %v1432_v31 = vadd.f32 %v2246_v51, %v1382_v30 }
 0x3f0   : > { %v1386_v32 = vpop.f32.mrf.mxu1 }
 0x3f1   : > { %1609 = vst [vmem:[%s2251_s12 + $0x68] sm:$0xff] %v1432_v31  ;;  %v1433_v38 = vadd.f32 %v2244_v50, %v1386_v32 }
 0x3f2   : > { %v1388_v39 = vpop.f32.mrf.mxu1 }
 0x3f3   : > { %1610 = vst [vmem:[%s2251_s12 + $0x70] sm:$0xff] %v1433_v38  ;;  %v1434_v34 = vadd.f32 %v2246_v51, %v1388_v39 }
 0x3f4   : > { %v1390_v40 = vpop.f32.mrf.mxu1 }
 0x3f5   : > { %1611 = vst [vmem:[%s2251_s12 + $0x78] sm:$0xff] %v1434_v34 }
 0x3f6   : > { %v1391_v42 = vpop.f32.mrf.mxu1 }
 0x3f7 PF: > { %s20_s29 = sadd.s32 1, %s1902_s29  }
 0x3f8   : > { %p17_p2 = scmp.ge.s32.totalorder %s20_s29, 4  }
 0x3fa   :  { %19 = sbr.rel (!%p17_p2) target bundleno = 3 (0x3), region = 92 }
 0x3ff   :  { %1464 = vsyncpa [#allocation6], 1 }
 0x400   :  { %1466 = vsyncpa [#allocation6 + $0x1], 1 }

</bundles_post_ra>
